<compile_context>
chip_gen: v7x
topology: tpu7x:2x2x1
jax: 0.10.0
libtpu: 0.0.40
codegen_flags: <defaults>
</compile_context>

<pallas_src>
import functools

import jax
import jax.numpy as jnp
from jax.experimental import pallas as pl
from jax.experimental.pallas import tpu as pltpu


# ----------------------------------------------------------------------------
# Small helpers
# ----------------------------------------------------------------------------
def _round_up(x, m):
    return ((x + m - 1) // m) * m


def _choose_tile(n_pad):
    """Largest of (512, 256, 128) that divides n_pad (n_pad is a mult of 128)."""
    for c in (512, 256, 128):
        if n_pad % c == 0:
            return c
    return n_pad


# ----------------------------------------------------------------------------
# Pallas kernels
# ----------------------------------------------------------------------------
def _transform_kernel(x_ref, scale_ref, shift_ref, w_ref, out_ref, *, apply_relu):
    """XW tile = relu?(x * scale + shift) @ W.  BN prologue in f32, matmul bf16."""
    h = x_ref[...] * scale_ref[...] + shift_ref[...]            # f32 elementwise
    if apply_relu:
        h = jnp.maximum(h, 0.0)
    out_ref[...] = jnp.dot(h.astype(jnp.bfloat16), w_ref[...],
                           preferred_element_type=jnp.float32).astype(jnp.bfloat16)


def _aggregate_kernel(a_ref, xw_ref, h_ref, sum_ref, sq_ref):
    """H row-tile = sum_k A(i,k) @ XW(k); emit per-row-tile BN partial stats."""
    k = pl.program_id(1)

    @pl.when(k == 0)
    def _():
        h_ref[...] = jnp.zeros_like(h_ref)

    h_ref[...] += jnp.dot(a_ref[...], xw_ref[...],
                          preferred_element_type=jnp.float32)

    @pl.when(k == pl.num_programs(1) - 1)
    def _():
        h = h_ref[...]
        csum = jnp.sum(h, axis=0, keepdims=True)                 # (1, E_pad)
        csq = jnp.sum(h * h, axis=0, keepdims=True)              # (1, E_pad)
        sum_ref[...] = jnp.broadcast_to(csum, sum_ref.shape)
        sq_ref[...] = jnp.broadcast_to(csq, sq_ref.shape)


def _bn_pool_kernel(h_ref, scale_ref, shift_ref, p_ref, hn_ref, pool_ref):
    """Final-layer BatchNorm (folded scale/shift, no ReLU) fused with
    global_add_pool = P @ BN(H) accumulated over row tiles."""
    hn = h_ref[...] * scale_ref[...] + shift_ref[...]
    hn_ref[...] = hn

    @pl.when(pl.program_id(0) == 0)
    def _():
        pool_ref[...] = jnp.zeros_like(pool_ref)

    pool_ref[...] += jnp.dot(p_ref[...], hn, preferred_element_type=jnp.float32)


# ----------------------------------------------------------------------------
# pallas_call wrappers
# ----------------------------------------------------------------------------
def transform_matmul(h, scale, shift, w_bf16, *, apply_relu, tm):
    n_pad, fin = h.shape
    e_pad = w_bf16.shape[1]
    kernel = functools.partial(_transform_kernel, apply_relu=apply_relu)
    return pl.pallas_call(
        kernel,
        out_shape=jax.ShapeDtypeStruct((n_pad, e_pad), jnp.bfloat16),
        grid=(n_pad // tm,),
        in_specs=[
            pl.BlockSpec((tm, fin), lambda i: (i, 0)),
            pl.BlockSpec((1, fin), lambda i: (0, 0)),
            pl.BlockSpec((1, fin), lambda i: (0, 0)),
            pl.BlockSpec((fin, e_pad), lambda i: (0, 0)),
        ],
        out_specs=pl.BlockSpec((tm, e_pad), lambda i: (i, 0)),
        compiler_params=pltpu.CompilerParams(
            dimension_semantics=("parallel",)),
    )(h, scale, shift, w_bf16)


def aggregate(a_bf16, xw_bf16, *, tm, tk):
    n_pad = a_bf16.shape[0]
    e_pad = xw_bf16.shape[1]
    n_i = n_pad // tm
    n_k = n_pad // tk
    out_shape = (
        jax.ShapeDtypeStruct((n_pad, e_pad), jnp.float32),       # H
        jax.ShapeDtypeStruct((n_i * 8, e_pad), jnp.float32),     # partial col sums
        jax.ShapeDtypeStruct((n_i * 8, e_pad), jnp.float32),     # partial col sumsq
    )
    return pl.pallas_call(
        _aggregate_kernel,
        out_shape=out_shape,
        grid=(n_i, n_k),
        in_specs=[
            pl.BlockSpec((tm, tk), lambda i, k: (i, k)),
            pl.BlockSpec((tk, e_pad), lambda i, k: (k, 0)),
        ],
        out_specs=(
            pl.BlockSpec((tm, e_pad), lambda i, k: (i, 0)),
            pl.BlockSpec((8, e_pad), lambda i, k: (i, 0)),
            pl.BlockSpec((8, e_pad), lambda i, k: (i, 0)),
        ),
        compiler_params=pltpu.CompilerParams(
            dimension_semantics=("parallel", "arbitrary")),
    )(a_bf16, xw_bf16)


def bn_apply_and_pool(h, scale, shift, p_mat, *, tm):
    """Returns (BN(h), P @ BN(h)) in one pass over h."""
    n_pad, e_pad = h.shape
    g_pad = p_mat.shape[0]
    return pl.pallas_call(
        _bn_pool_kernel,
        out_shape=(
            jax.ShapeDtypeStruct((n_pad, e_pad), jnp.float32),
            jax.ShapeDtypeStruct((g_pad, e_pad), jnp.float32),
        ),
        grid=(n_pad // tm,),
        in_specs=[
            pl.BlockSpec((tm, e_pad), lambda i: (i, 0)),
            pl.BlockSpec((1, e_pad), lambda i: (0, 0)),
            pl.BlockSpec((1, e_pad), lambda i: (0, 0)),
            pl.BlockSpec((g_pad, tm), lambda i: (0, i)),
        ],
        out_specs=(
            pl.BlockSpec((tm, e_pad), lambda i: (i, 0)),
            pl.BlockSpec((g_pad, e_pad), lambda i: (0, 0)),
        ),
        compiler_params=pltpu.CompilerParams(
            dimension_semantics=("arbitrary",)),
    )(h, scale, shift, p_mat)


# ----------------------------------------------------------------------------
# Glue: normalized adjacency, pooling matrix, BatchNorm fold (plain JAX)
# ----------------------------------------------------------------------------
def build_gcn_norm_adj(edge_index, num_nodes, n_pad):
    """Dense bf16 D^-1/2 (A + I) D^-1/2, padded to (n_pad, n_pad).

    Matches PyG GCNConv(normalize=True, add_self_loops=True) with unit edge
    weights: existing self-loops are replaced by a single unit-weight loop per
    node (add_remaining_self_loops with edge_weight=None); A_norm[dst, src]=norm.
    """
    row = edge_index[0]
    col = edge_index[1]
    # Zero-out pre-existing self-loops (replaced by the canonical unit loop).
    ew = jnp.where(row != col, 1.0, 0.0).astype(jnp.float32)
    loop = jnp.arange(num_nodes, dtype=row.dtype)
    row = jnp.concatenate([row, loop])
    col = jnp.concatenate([col, loop])
    ew = jnp.concatenate([ew, jnp.ones(num_nodes, jnp.float32)])

    deg = jnp.zeros(num_nodes, jnp.float32).at[col].add(ew)
    dinv = jnp.where(deg > 0, jax.lax.rsqrt(deg), 0.0)
    norm = dinv[row] * ew * dinv[col]
    # Accumulate in f32 (duplicate edges add exactly), cast once to bf16.
    a = jnp.zeros((n_pad, n_pad), jnp.float32).at[col, row].add(norm)
    return a.astype(jnp.bfloat16)


def build_pool_matrix(batch, num_graphs, g_pad, n_pad):
    p = (batch[None, :] == jnp.arange(num_graphs)[:, None]).astype(jnp.float32)
    return jnp.pad(p, ((0, g_pad - num_graphs), (0, n_pad - batch.shape[0])))


def fold_batchnorm(sum_part, sq_part, n_real, gamma_pad, beta_pad, eps=1e-5):
    """Reduce per-row-tile partial stats and fold BN into (scale, shift).
    Biased variance, matching torch.nn.BatchNorm1d in training mode."""
    e_pad = sum_part.shape[1]
    s = jnp.sum(sum_part.reshape(-1, 8, e_pad)[:, 0, :], axis=0)
    sq = jnp.sum(sq_part.reshape(-1, 8, e_pad)[:, 0, :], axis=0)
    mean = s / n_real
    var = jnp.maximum(sq / n_real - mean * mean, 0.0)
    inv = jax.lax.rsqrt(var + eps)
    scale = gamma_pad[0] * inv
    shift = beta_pad[0] - mean * scale
    return scale[None, :], shift[None, :]


# ----------------------------------------------------------------------------
# Full encoder forward (standard pooling)
# ----------------------------------------------------------------------------
@functools.partial(jax.jit, static_argnames=("num_graphs",))
def gcn_encoder_forward(params, batch, x, edge_index, num_graphs):
    n, f = x.shape
    emb = params["W"][0].shape[1]
    num_layers = len(params["W"])

    n_pad = _round_up(n, 128)
    tm = _choose_tile(n_pad)
    tk = tm
    f_pad = _round_up(f, 128)
    e_pad = _round_up(emb, 128)
    g_pad = _round_up(max(num_graphs, 1), 8)

    a = build_gcn_norm_adj(edge_index, n, n_pad)             # bf16 (n_pad, n_pad)
    p_mat = build_pool_matrix(batch, num_graphs, g_pad, n_pad)

    h = jnp.pad(x.astype(jnp.float32), ((0, n_pad - n), (0, f_pad - f)))
    scale = jnp.ones((1, f_pad), jnp.float32)                 # identity prologue
    shift = jnp.zeros((1, f_pad), jnp.float32)

    for i in range(num_layers):
        w = params["W"][i]
        fin = w.shape[0]
        fin_pad = f_pad if i == 0 else e_pad
        # Note: GCNConv bias is dropped — BatchNorm's mean subtraction cancels a
        # per-feature additive constant exactly, so the output is unchanged.
        w_p = jnp.pad(w, ((0, fin_pad - fin), (0, e_pad - emb))).astype(jnp.bfloat16)
        gamma_p = jnp.pad(params["gamma"][i], ((0, 0), (0, e_pad - emb)))
        beta_p = jnp.pad(params["beta"][i], ((0, 0), (0, e_pad - emb)))

        # XW = relu?(BN_prev(H_prev)) @ W_i   (layer 0: identity prologue)
        xw = transform_matmul(h, scale, shift, w_p, apply_relu=(i > 0), tm=tm)
        # H = A_norm @ XW  +  per-row-tile partial BN stats
        h, s_part, sq_part = aggregate(a, xw, tm=tm, tk=tk)
        # BatchNorm statistics over all N real nodes (padded rows are exactly 0).
        scale, shift = fold_batchnorm(s_part, sq_part, n, gamma_p, beta_p)
        # dropout(p=0.0) == identity

    # Final layer: BN (no ReLU) fused with global add pooling in one pass over H.
    h_norm, xpool = bn_apply_and_pool(h, scale, shift, p_mat, tm=tm)
    return xpool[:num_graphs, :emb], h_norm[:n, :emb]


# ----------------------------------------------------------------------------
# Deterministic parameter init (unpadded, PyTorch-module-shaped)
# ----------------------------------------------------------------------------
def init_params(key, num_dataset_features, emb_dim, num_gc_layers):
    ws, gammas, betas = [], [], []
    for i in range(num_gc_layers):
        in_dim = num_dataset_features if i == 0 else emb_dim
        key, k1, k3, k4 = jax.random.split(key, 4)
        s = 1.0 / jnp.sqrt(jnp.float32(in_dim))
        ws.append(jax.random.normal(k1, (in_dim, emb_dim), jnp.float32) * s)
        gammas.append(1.0 + 0.1 * jax.random.normal(k3, (1, emb_dim), jnp.float32))
        betas.append(0.1 * jax.random.normal(k4, (1, emb_dim), jnp.float32))
    return {"W": ws, "gamma": gammas, "beta": betas}


if __name__ == "__main__":
    # Small, deterministic problem instance.
    num_dataset_features = 16
    emb_dim = 32
    num_gc_layers = 3
    num_nodes = 32
    num_graphs = 2
    num_edges = 64

    key = jax.random.PRNGKey(0)
    key, kx, ke = jax.random.split(key, 3)

    x = jax.random.normal(kx, (num_nodes, num_dataset_features), jnp.float32)
    edge_index = jax.random.randint(ke, (2, num_edges), 0, num_nodes, jnp.int32)
    # Two graphs of 16 nodes each.
    batch = jnp.concatenate([jnp.zeros(16, jnp.int32), jnp.ones(16, jnp.int32)])

    params = init_params(key, num_dataset_features, emb_dim, num_gc_layers)

    xpool, node_emb = gcn_encoder_forward(params, batch, x, edge_index, num_graphs)
    jax.block_until_ready((xpool, node_emb))

    assert xpool.shape == (num_graphs, emb_dim)
    assert node_emb.shape == (num_nodes, emb_dim)
    assert bool(jnp.all(jnp.isfinite(xpool))) and bool(jnp.all(jnp.isfinite(node_emb)))
    print("KERNEL_OK")
</pallas_src>

<mosaic_0001>
module attributes {stable_mosaic.version = 11 : i64} {
  func.func private @main(%arg0: i32) attributes {dimension_semantics = [#tpu.dimension_semantics<core_parallel>], iteration_bounds = array<i64: 2>, tpu.core_type = #tpu.core_type<sc_scalar_subcore>, window_params = []} {
    return
  }
}

module attributes {stable_mosaic.version = 11 : i64} {
  func.func private @main(%arg0: i32) attributes {dimension_semantics = [#tpu.dimension_semantics<core_parallel>], iteration_bounds = array<i64: 2>, tpu.core_type = #tpu.core_type<sc_scalar_subcore>, window_params = []} {
    return
  }
}

module attributes {stable_mosaic.version = 11 : i64} {
  func.func @_transform_kernel(%arg0: i32, %arg1: memref<128x128xf32, #tpu.memory_space<vmem>>, %arg2: memref<1x128xf32, #tpu.memory_space<vmem>>, %arg3: memref<1x128xf32, #tpu.memory_space<vmem>>, %arg4: memref<128x128xbf16, #tpu.memory_space<vmem>>, %arg5: memref<128x128xbf16, #tpu.memory_space<vmem>>) attributes {dimension_semantics = [#tpu.dimension_semantics<parallel>], iteration_bounds = array<i64: 1>, scalar_prefetch = 0 : i64, scratch_operands = 0 : i64, tpu.core_type = #tpu.core_type<tc>, window_params = [{transform_indices = @transform_0, window_bounds = array<i64: 128, 128>}, {pipeline_mode = #tpu.pipeline_mode<synchronous>, transform_indices = @transform_1, window_bounds = array<i64: 1, 128>}, {pipeline_mode = #tpu.pipeline_mode<synchronous>, transform_indices = @transform_2, window_bounds = array<i64: 1, 128>}, {pipeline_mode = #tpu.pipeline_mode<synchronous>, transform_indices = @transform_3, window_bounds = array<i64: 128, 128>}, {transform_indices = @transform_4, window_bounds = array<i64: 128, 128>}]} {
    %c0 = arith.constant 0 : index
    %c0_0 = arith.constant 0 : index
    %0 = vector.load %arg1[%c0, %c0_0] : memref<128x128xf32, #tpu.memory_space<vmem>>, vector<128x128xf32>
    %c0_1 = arith.constant 0 : index
    %c0_2 = arith.constant 0 : index
    %1 = vector.load %arg2[%c0_1, %c0_2] : memref<1x128xf32, #tpu.memory_space<vmem>>, vector<1x128xf32>
    %2 = vector.broadcast %1 : vector<1x128xf32> to vector<128x128xf32>
    %3 = arith.mulf %0, %2 : vector<128x128xf32>
    %c0_3 = arith.constant 0 : index
    %c0_4 = arith.constant 0 : index
    %4 = vector.load %arg3[%c0_3, %c0_4] : memref<1x128xf32, #tpu.memory_space<vmem>>, vector<1x128xf32>
    %5 = vector.broadcast %4 : vector<1x128xf32> to vector<128x128xf32>
    %6 = arith.addf %3, %5 : vector<128x128xf32>
    %7 = arith.truncf %6 : vector<128x128xf32> to vector<128x128xbf16>
    %c0_5 = arith.constant 0 : index
    %c0_6 = arith.constant 0 : index
    %8 = vector.load %arg4[%c0_5, %c0_6] : memref<128x128xbf16, #tpu.memory_space<vmem>>, vector<128x128xbf16>
    %cst = arith.constant dense<0.000000e+00> : vector<128x128xf32>
    %9 = tpu.matmul %7, %8, %cst {dimension_numbers = #tpu.dot_dimension_numbers<[1], [0], [0], [1], [0, 0, 1, 1], [], []>} : vector<128x128xbf16>, vector<128x128xbf16>, vector<128x128xf32> -> vector<128x128xf32>
    %10 = arith.truncf %9 : vector<128x128xf32> to vector<128x128xbf16>
    %c0_7 = arith.constant 0 : index
    %c0_8 = arith.constant 0 : index
    %11 = vector.load %arg5[%c0_7, %c0_8] : memref<128x128xbf16, #tpu.memory_space<vmem>>, vector<128x128xbf16>
    tpu.vector_store %arg5[%c0_7, %c0_8], %10 {strides = array<i32>} : memref<128x128xbf16, #tpu.memory_space<vmem>>, vector<128x128xbf16>,
    return
  }
  func.func @transform_0(%arg0: i32) -> (i32, i32) {
    %c0_i32 = arith.constant 0 : i32
    %c0_i32_0 = arith.constant 0 : i32
    return %arg0, %c0_i32 : i32, i32
  }
  func.func @transform_1(%arg0: i32) -> (i32, i32) {
    %c0_i32 = arith.constant 0 : i32
    %c0_i32_0 = arith.constant 0 : i32
    %c0_i32_1 = arith.constant 0 : i32
    return %c0_i32, %c0_i32_0 : i32, i32
  }
  func.func @transform_2(%arg0: i32) -> (i32, i32) {
    %c0_i32 = arith.constant 0 : i32
    %c0_i32_0 = arith.constant 0 : i32
    %c0_i32_1 = arith.constant 0 : i32
    return %c0_i32, %c0_i32_0 : i32, i32
  }
  func.func @transform_3(%arg0: i32) -> (i32, i32) {
    %c0_i32 = arith.constant 0 : i32
    %c0_i32_0 = arith.constant 0 : i32
    %c0_i32_1 = arith.constant 0 : i32
    return %c0_i32, %c0_i32_0 : i32, i32
  }
  func.func @transform_4(%arg0: i32) -> (i32, i32) {
    %c0_i32 = arith.constant 0 : i32
    %c0_i32_0 = arith.constant 0 : i32
    return %arg0, %c0_i32 : i32, i32
  }
}

module attributes {stable_mosaic.version = 11 : i64} {
  func.func @_transform_kernel(%arg0: i32, %arg1: memref<128x128xf32, #tpu.memory_space<vmem>>, %arg2: memref<1x128xf32, #tpu.memory_space<vmem>>, %arg3: memref<1x128xf32, #tpu.memory_space<vmem>>, %arg4: memref<128x128xbf16, #tpu.memory_space<vmem>>, %arg5: memref<128x128xbf16, #tpu.memory_space<vmem>>) attributes {dimension_semantics = [#tpu.dimension_semantics<parallel>], iteration_bounds = array<i64: 1>, scalar_prefetch = 0 : i64, scratch_operands = 0 : i64, tpu.core_type = #tpu.core_type<tc>, window_params = [{transform_indices = @transform_0, window_bounds = array<i64: 128, 128>}, {pipeline_mode = #tpu.pipeline_mode<synchronous>, transform_indices = @transform_1, window_bounds = array<i64: 1, 128>}, {pipeline_mode = #tpu.pipeline_mode<synchronous>, transform_indices = @transform_2, window_bounds = array<i64: 1, 128>}, {pipeline_mode = #tpu.pipeline_mode<synchronous>, transform_indices = @transform_3, window_bounds = array<i64: 128, 128>}, {transform_indices = @transform_4, window_bounds = array<i64: 128, 128>}]} {
    %c0 = arith.constant 0 : index
    %c0_0 = arith.constant 0 : index
    %0 = vector.load %arg1[%c0, %c0_0] : memref<128x128xf32, #tpu.memory_space<vmem>>, vector<128x128xf32>
    %c0_1 = arith.constant 0 : index
    %c0_2 = arith.constant 0 : index
    %1 = vector.load %arg2[%c0_1, %c0_2] : memref<1x128xf32, #tpu.memory_space<vmem>>, vector<1x128xf32>
    %2 = vector.broadcast %1 : vector<1x128xf32> to vector<128x128xf32>
    %3 = arith.mulf %0, %2 : vector<128x128xf32>
    %c0_3 = arith.constant 0 : index
    %c0_4 = arith.constant 0 : index
    %4 = vector.load %arg3[%c0_3, %c0_4] : memref<1x128xf32, #tpu.memory_space<vmem>>, vector<1x128xf32>
    %5 = vector.broadcast %4 : vector<1x128xf32> to vector<128x128xf32>
    %6 = arith.addf %3, %5 : vector<128x128xf32>
    %cst = arith.constant 0.000000e+00 : f32
    %7 = vector.broadcast %cst : f32 to vector<128x128xf32>
    %8 = arith.maximumf %6, %7 : vector<128x128xf32>
    %9 = arith.truncf %8 : vector<128x128xf32> to vector<128x128xbf16>
    %c0_5 = arith.constant 0 : index
    %c0_6 = arith.constant 0 : index
    %10 = vector.load %arg4[%c0_5, %c0_6] : memref<128x128xbf16, #tpu.memory_space<vmem>>, vector<128x128xbf16>
    %cst_7 = arith.constant dense<0.000000e+00> : vector<128x128xf32>
    %11 = tpu.matmul %9, %10, %cst_7 {dimension_numbers = #tpu.dot_dimension_numbers<[1], [0], [0], [1], [0, 0, 1, 1], [], []>} : vector<128x128xbf16>, vector<128x128xbf16>, vector<128x128xf32> -> vector<128x128xf32>
    %12 = arith.truncf %11 : vector<128x128xf32> to vector<128x128xbf16>
    %c0_8 = arith.constant 0 : index
    %c0_9 = arith.constant 0 : index
    %13 = vector.load %arg5[%c0_8, %c0_9] : memref<128x128xbf16, #tpu.memory_space<vmem>>, vector<128x128xbf16>
    tpu.vector_store %arg5[%c0_8, %c0_9], %12 {strides = array<i32>} : memref<128x128xbf16, #tpu.memory_space<vmem>>, vector<128x128xbf16>,
    return
  }
  func.func @transform_0(%arg0: i32) -> (i32, i32) {
    %c0_i32 = arith.constant 0 : i32
    %c0_i32_0 = arith.constant 0 : i32
    return %arg0, %c0_i32 : i32, i32
  }
  func.func @transform_1(%arg0: i32) -> (i32, i32) {
    %c0_i32 = arith.constant 0 : i32
    %c0_i32_0 = arith.constant 0 : i32
    %c0_i32_1 = arith.constant 0 : i32
    return %c0_i32, %c0_i32_0 : i32, i32
  }
  func.func @transform_2(%arg0: i32) -> (i32, i32) {
    %c0_i32 = arith.constant 0 : i32
    %c0_i32_0 = arith.constant 0 : i32
    %c0_i32_1 = arith.constant 0 : i32
    return %c0_i32, %c0_i32_0 : i32, i32
  }
  func.func @transform_3(%arg0: i32) -> (i32, i32) {
    %c0_i32 = arith.constant 0 : i32
    %c0_i32_0 = arith.constant 0 : i32
    %c0_i32_1 = arith.constant 0 : i32
    return %c0_i32, %c0_i32_0 : i32, i32
  }
  func.func @transform_4(%arg0: i32) -> (i32, i32) {
    %c0_i32 = arith.constant 0 : i32
    %c0_i32_0 = arith.constant 0 : i32
    return %arg0, %c0_i32 : i32, i32
  }
}

module attributes {stable_mosaic.version = 11 : i64} {
  func.func @_aggregate_kernel(%arg0: i32, %arg1: i32, %arg2: memref<128x128xbf16, #tpu.memory_space<vmem>>, %arg3: memref<128x128xbf16, #tpu.memory_space<vmem>>, %arg4: memref<128x128xf32, #tpu.memory_space<vmem>>, %arg5: memref<8x128xf32, #tpu.memory_space<vmem>>, %arg6: memref<8x128xf32, #tpu.memory_space<vmem>>) attributes {dimension_semantics = [#tpu.dimension_semantics<parallel>, #tpu.dimension_semantics<arbitrary>], iteration_bounds = array<i64: 1, 1>, scalar_prefetch = 0 : i64, scratch_operands = 0 : i64, tpu.core_type = #tpu.core_type<tc>, window_params = [{transform_indices = @transform_0, window_bounds = array<i64: 128, 128>}, {transform_indices = @transform_1, window_bounds = array<i64: 128, 128>}, {transform_indices = @transform_2, window_bounds = array<i64: 128, 128>}, {transform_indices = @transform_3, window_bounds = array<i64: 8, 128>}, {transform_indices = @transform_4, window_bounds = array<i64: 8, 128>}]} {
    %c0_i32 = arith.constant 0 : i32
    %0 = arith.cmpi eq, %arg1, %c0_i32 : i32
    %1 = arith.extui %0 : i1 to i32
    %c0_i32_0 = arith.constant 0 : i32
    %2 = arith.cmpi ne, %1, %c0_i32_0 : i32
    scf.if %2 {
      %cst_10 = arith.constant 0.000000e+00 : f32
      %12 = vector.broadcast %cst_10 : f32 to vector<128x128xf32>
      %c0_11 = arith.constant 0 : index
      %c0_12 = arith.constant 0 : index
      %13 = vector.load %arg4[%c0_11, %c0_12] : memref<128x128xf32, #tpu.memory_space<vmem>>, vector<128x128xf32>
      tpu.vector_store %arg4[%c0_11, %c0_12], %12 {strides = array<i32>} : memref<128x128xf32, #tpu.memory_space<vmem>>, vector<128x128xf32>,
    } else {
    }
    %c0 = arith.constant 0 : index
    %c0_1 = arith.constant 0 : index
    %3 = vector.load %arg4[%c0, %c0_1] : memref<128x128xf32, #tpu.memory_space<vmem>>, vector<128x128xf32>
    %c0_2 = arith.constant 0 : index
    %c0_3 = arith.constant 0 : index
    %4 = vector.load %arg2[%c0_2, %c0_3] : memref<128x128xbf16, #tpu.memory_space<vmem>>, vector<128x128xbf16>
    %c0_4 = arith.constant 0 : index
    %c0_5 = arith.constant 0 : index
    %5 = vector.load %arg3[%c0_4, %c0_5] : memref<128x128xbf16, #tpu.memory_space<vmem>>, vector<128x128xbf16>
    %cst = arith.constant dense<0.000000e+00> : vector<128x128xf32>
    %6 = tpu.matmul %4, %5, %cst {dimension_numbers = #tpu.dot_dimension_numbers<[1], [0], [0], [1], [0, 0, 1, 1], [], []>} : vector<128x128xbf16>, vector<128x128xbf16>, vector<128x128xf32> -> vector<128x128xf32>
    %7 = arith.addf %3, %6 : vector<128x128xf32>
    %c0_6 = arith.constant 0 : index
    %c0_7 = arith.constant 0 : index
    %8 = vector.load %arg4[%c0_6, %c0_7] : memref<128x128xf32, #tpu.memory_space<vmem>>, vector<128x128xf32>
    tpu.vector_store %arg4[%c0_6, %c0_7], %7 {strides = array<i32>} : memref<128x128xf32, #tpu.memory_space<vmem>>, vector<128x128xf32>,
    %c0_i32_8 = arith.constant 0 : i32
    %9 = arith.cmpi eq, %arg1, %c0_i32_8 : i32
    %10 = arith.extui %9 : i1 to i32
    %c0_i32_9 = arith.constant 0 : i32
    %11 = arith.cmpi ne, %10, %c0_i32_9 : i32
    scf.if %11 {
      %c0_10 = arith.constant 0 : index
      %c0_11 = arith.constant 0 : index
      %12 = vector.load %arg4[%c0_10, %c0_11] : memref<128x128xf32, #tpu.memory_space<vmem>>, vector<128x128xf32>
      %cst_12 = arith.constant dense<0.000000e+00> : vector<128xf32>
      %13 = vector.multi_reduction <add>, %12, %cst_12 [0] : vector<128x128xf32> to vector<128xf32>
      %14 = vector.shape_cast %13 : vector<128xf32> to vector<1x128xf32>
      %15 = arith.mulf %12, %12 : vector<128x128xf32>
      %cst_13 = arith.constant dense<0.000000e+00> : vector<128xf32>
      %16 = vector.multi_reduction <add>, %15, %cst_13 [0] : vector<128x128xf32> to vector<128xf32>
      %17 = vector.shape_cast %16 : vector<128xf32> to vector<1x128xf32>
      %18 = vector.shape_cast %14 : vector<1x128xf32> to vector<1x128xf32>
      %19 = vector.broadcast %18 : vector<1x128xf32> to vector<8x128xf32>
      %c0_14 = arith.constant 0 : index
      %c0_15 = arith.constant 0 : index
      %20 = vector.load %arg5[%c0_14, %c0_15] : memref<8x128xf32, #tpu.memory_space<vmem>>, vector<8x128xf32>
      tpu.vector_store %arg5[%c0_14, %c0_15], %19 {strides = array<i32>} : memref<8x128xf32, #tpu.memory_space<vmem>>, vector<8x128xf32>,
      %21 = vector.shape_cast %17 : vector<1x128xf32> to vector<1x128xf32>
      %22 = vector.broadcast %21 : vector<1x128xf32> to vector<8x128xf32>
      %c0_16 = arith.constant 0 : index
      %c0_17 = arith.constant 0 : index
      %23 = vector.load %arg6[%c0_16, %c0_17] : memref<8x128xf32, #tpu.memory_space<vmem>>, vector<8x128xf32>
      tpu.vector_store %arg6[%c0_16, %c0_17], %22 {strides = array<i32>} : memref<8x128xf32, #tpu.memory_space<vmem>>, vector<8x128xf32>,
    } else {
    }
    return
  }
  func.func @transform_0(%arg0: i32, %arg1: i32) -> (i32, i32) {
    %c0_i32 = arith.constant 0 : i32
    return %arg0, %arg1 : i32, i32
  }
  func.func @transform_1(%arg0: i32, %arg1: i32) -> (i32, i32) {
    %c0_i32 = arith.constant 0 : i32
    %c0_i32_0 = arith.constant 0 : i32
    return %arg1, %c0_i32 : i32, i32
  }
  func.func @transform_2(%arg0: i32, %arg1: i32) -> (i32, i32) {
    %c0_i32 = arith.constant 0 : i32
    %c0_i32_0 = arith.constant 0 : i32
    return %arg0, %c0_i32 : i32, i32
  }
  func.func @transform_3(%arg0: i32, %arg1: i32) -> (i32, i32) {
    %c0_i32 = arith.constant 0 : i32
    %c0_i32_0 = arith.constant 0 : i32
    return %arg0, %c0_i32 : i32, i32
  }
  func.func @transform_4(%arg0: i32, %arg1: i32) -> (i32, i32) {
    %c0_i32 = arith.constant 0 : i32
    %c0_i32_0 = arith.constant 0 : i32
    return %arg0, %c0_i32 : i32, i32
  }
}

module attributes {stable_mosaic.version = 11 : i64} {
  func.func @_bn_pool_kernel(%arg0: i32, %arg1: memref<128x128xf32, #tpu.memory_space<vmem>>, %arg2: memref<1x128xf32, #tpu.memory_space<vmem>>, %arg3: memref<1x128xf32, #tpu.memory_space<vmem>>, %arg4: memref<8x128xf32, #tpu.memory_space<vmem>>, %arg5: memref<128x128xf32, #tpu.memory_space<vmem>>, %arg6: memref<8x128xf32, #tpu.memory_space<vmem>>) attributes {dimension_semantics = [#tpu.dimension_semantics<arbitrary>], iteration_bounds = array<i64: 1>, scalar_prefetch = 0 : i64, scratch_operands = 0 : i64, tpu.core_type = #tpu.core_type<tc>, window_params = [{transform_indices = @transform_0, window_bounds = array<i64: 128, 128>}, {pipeline_mode = #tpu.pipeline_mode<synchronous>, transform_indices = @transform_1, window_bounds = array<i64: 1, 128>}, {pipeline_mode = #tpu.pipeline_mode<synchronous>, transform_indices = @transform_2, window_bounds = array<i64: 1, 128>}, {transform_indices = @transform_3, window_bounds = array<i64: 8, 128>}, {transform_indices = @transform_4, window_bounds = array<i64: 128, 128>}, {pipeline_mode = #tpu.pipeline_mode<synchronous>, transform_indices = @transform_5, window_bounds = array<i64: 8, 128>}]} {
    %c0 = arith.constant 0 : index
    %c0_0 = arith.constant 0 : index
    %0 = vector.load %arg1[%c0, %c0_0] : memref<128x128xf32, #tpu.memory_space<vmem>>, vector<128x128xf32>
    %c0_1 = arith.constant 0 : index
    %c0_2 = arith.constant 0 : index
    %1 = vector.load %arg2[%c0_1, %c0_2] : memref<1x128xf32, #tpu.memory_space<vmem>>, vector<1x128xf32>
    %2 = vector.broadcast %1 : vector<1x128xf32> to vector<128x128xf32>
    %3 = arith.mulf %0, %2 : vector<128x128xf32>
    %c0_3 = arith.constant 0 : index
    %c0_4 = arith.constant 0 : index
    %4 = vector.load %arg3[%c0_3, %c0_4] : memref<1x128xf32, #tpu.memory_space<vmem>>, vector<1x128xf32>
    %5 = vector.broadcast %4 : vector<1x128xf32> to vector<128x128xf32>
    %6 = arith.addf %3, %5 : vector<128x128xf32>
    %c0_5 = arith.constant 0 : index
    %c0_6 = arith.constant 0 : index
    %7 = vector.load %arg5[%c0_5, %c0_6] : memref<128x128xf32, #tpu.memory_space<vmem>>, vector<128x128xf32>
    tpu.vector_store %arg5[%c0_5, %c0_6], %6 {strides = array<i32>} : memref<128x128xf32, #tpu.memory_space<vmem>>, vector<128x128xf32>,
    %c0_i32 = arith.constant 0 : i32
    %8 = arith.cmpi eq, %arg0, %c0_i32 : i32
    %9 = arith.extui %8 : i1 to i32
    %c0_i32_7 = arith.constant 0 : i32
    %10 = arith.cmpi ne, %9, %c0_i32_7 : i32
    scf.if %10 {
      %cst_14 = arith.constant 0.000000e+00 : f32
      %16 = vector.broadcast %cst_14 : f32 to vector<8x128xf32>
      %c0_15 = arith.constant 0 : index
      %c0_16 = arith.constant 0 : index
      %17 = vector.load %arg6[%c0_15, %c0_16] : memref<8x128xf32, #tpu.memory_space<vmem>>, vector<8x128xf32>
      tpu.vector_store %arg6[%c0_15, %c0_16], %16 {strides = array<i32>} : memref<8x128xf32, #tpu.memory_space<vmem>>, vector<8x128xf32>,
    } else {
    }
    %c0_8 = arith.constant 0 : index
    %c0_9 = arith.constant 0 : index
    %11 = vector.load %arg6[%c0_8, %c0_9] : memref<8x128xf32, #tpu.memory_space<vmem>>, vector<8x128xf32>
    %c0_10 = arith.constant 0 : index
    %c0_11 = arith.constant 0 : index
    %12 = vector.load %arg4[%c0_10, %c0_11] : memref<8x128xf32, #tpu.memory_space<vmem>>, vector<8x128xf32>
    %cst = arith.constant dense<0.000000e+00> : vector<8x128xf32>
    %13 = tpu.matmul %12, %6, %cst {dimension_numbers = #tpu.dot_dimension_numbers<[1], [0], [0], [1], [0, 0, 1, 1], [], []>} : vector<8x128xf32>, vector<128x128xf32>, vector<8x128xf32> -> vector<8x128xf32>
    %14 = arith.addf %11, %13 : vector<8x128xf32>
    %c0_12 = arith.constant 0 : index
    %c0_13 = arith.constant 0 : index
    %15 = vector.load %arg6[%c0_12, %c0_13] : memref<8x128xf32, #tpu.memory_space<vmem>>, vector<8x128xf32>
    tpu.vector_store %arg6[%c0_12, %c0_13], %14 {strides = array<i32>} : memref<8x128xf32, #tpu.memory_space<vmem>>, vector<8x128xf32>,
    return
  }
  func.func @transform_0(%arg0: i32) -> (i32, i32) {
    %c0_i32 = arith.constant 0 : i32
    %c0_i32_0 = arith.constant 0 : i32
    return %arg0, %c0_i32 : i32, i32
  }
  func.func @transform_1(%arg0: i32) -> (i32, i32) {
    %c0_i32 = arith.constant 0 : i32
    %c0_i32_0 = arith.constant 0 : i32
    %c0_i32_1 = arith.constant 0 : i32
    return %c0_i32, %c0_i32_0 : i32, i32
  }
  func.func @transform_2(%arg0: i32) -> (i32, i32) {
    %c0_i32 = arith.constant 0 : i32
    %c0_i32_0 = arith.constant 0 : i32
    %c0_i32_1 = arith.constant 0 : i32
    return %c0_i32, %c0_i32_0 : i32, i32
  }
  func.func @transform_3(%arg0: i32) -> (i32, i32) {
    %c0_i32 = arith.constant 0 : i32
    %c0_i32_0 = arith.constant 0 : i32
    return %c0_i32, %arg0 : i32, i32
  }
  func.func @transform_4(%arg0: i32) -> (i32, i32) {
    %c0_i32 = arith.constant 0 : i32
    %c0_i32_0 = arith.constant 0 : i32
    return %arg0, %c0_i32 : i32, i32
  }
  func.func @transform_5(%arg0: i32) -> (i32, i32) {
    %c0_i32 = arith.constant 0 : i32
    %c0_i32_0 = arith.constant 0 : i32
    %c0_i32_1 = arith.constant 0 : i32
    return %c0_i32, %c0_i32_0 : i32, i32
  }
}

</mosaic_0001>

<bundles_post_ra>
// kernel: gcn_encoder_forward.7
= control target key start
LH: loop header
LB: loop body
LE: loop exit
PB: predicated region body
PF: predicated region fallthrough
CT: control target
= control target key end

     0   :  { %s657_s3 = inlined_call_operand.vmem [shape: bf16[128,128], index: 3, kind: input, shape index: {}]   ;;  %s658_s0 = inlined_call_operand.vmem [shape: f32[128,128], index: 0, kind: input, shape index: {}]   ;;  %s659_s1 = inlined_call_operand.vmem [shape: f32[1,128], index: 1, kind: input, shape index: {}]   ;;  %s660_s2 = inlined_call_operand.vmem [shape: f32[1,128], index: 2, kind: input, shape index: {}]   ;;  %s661_s4 = inlined_call_operand.vmem [shape: bf16[128,128], index: 4, kind: output, shape index: {}]  }
   0x1   :  { %v486_v0 = vld [vmem:[%s657_s3] sm:$0xff]   ;;  %v487_v1 = vld [vmem:[%s657_s3 + $0x8] sm:$0xff]   ;;  %v488_v2 = vld [vmem:[%s657_s3 + $0x10] sm:$0xff]  }
   0x2   :  { %438 = vmatprep.subr.bf16.mxu0 %v486_v0  ;;  %470 = vmatprep.subr.bf16.mxu1 %v486_v0  ;;  %v489_v3 = vld [vmem:[%s657_s3 + $0x18] sm:$0xff]   ;;  %v18_v4 = vld [vmem:[%s658_s0] sm:$0xff]  ;;  %v19_v5 = vld [vmem:[%s658_s0 + $0x8] sm:$0xff] }
   0x3   :  { %439 = vmatpush3.bf16.msra.mxu0 %v486_v0  ;;  %478 = vmatpush3.bf16.msra.mxu1 %v486_v0  ;;  %v540_v6 = vld [vmem:[%s659_s1] ss:$0 sm:$0xff]  ;;  %v27_v11 = vld [vmem:[%s658_s0 + $0x48] sm:$0xff]  ;;  %v492_v22 = vld [vmem:[%s657_s3 + $0x30] sm:$0xff]  }
   0x4   :  { %440 = vmatprep.subr.bf16.mxu0 %v487_v1  ;;  %471 = vmatprep.subr.bf16.mxu1 %v487_v1  ;;  %v41_v7 = vmul.f32 %v540_v6, %v18_v4  ;;  %v42_v8 = vmul.f32 %v540_v6, %v19_v5  ;;  %v547_v9 = vld [vmem:[%s660_s2] ss:$0 sm:$0xff]  ;;  %v50_v13 = vmul.f32 %v540_v6, %v27_v11  ;;  %v491_v21 = vld [vmem:[%s657_s3 + $0x28] sm:$0xff]   ;;  %v20_v23 = vld [vmem:[%s658_s0 + $0x10] sm:$0xff] }
   0x5   :  { %v26_v10 = vld [vmem:[%s658_s0 + $0x40] sm:$0xff]  ;;  %v21_v24 = vld [vmem:[%s658_s0 + $0x18] sm:$0xff]  ;;  %v28_v25 = vld [vmem:[%s658_s0 + $0x50] sm:$0xff]  ;;  %v43_v31 = vmul.f32 %v540_v6, %v20_v23 }
   0x6   :  { %v49_v12 = vmul.f32 %v540_v6, %v26_v10  ;;  %v64_v14 = vadd.f32 %v547_v9, %v41_v7  ;;  %v65_v15 = vadd.f32 %v547_v9, %v42_v8  ;;  %v490_v16 = vld [vmem:[%s657_s3 + $0x20] sm:$0xff]   ;;  %v73_v18 = vadd.f32 %v547_v9, %v50_v13  ;;  %v29_v26 = vld [vmem:[%s658_s0 + $0x58] sm:$0xff]  ;;  %v23_v28 = vld [vmem:[%s658_s0 + $0x28] sm:$0xff] }
   0x7   :  { %441 = vmatpush3.bf16.msra.mxu0 %v487_v1  ;;  %479 = vmatpush3.bf16.msra.mxu1 %v487_v1  ;;  %v22_v27 = vld [vmem:[%s658_s0 + $0x20] sm:$0xff]  ;;  %v31_v30 = vld [vmem:[%s658_s0 + $0x68] sm:$0xff]  ;;  %v44_v32 = vmul.f32 %v540_v6, %v21_v24  ;;  %v51_v33 = vmul.f32 %v540_v6, %v28_v25  ;;  %v52_v34 = vmul.f32 %v540_v6, %v29_v26  ;;  %v493_v39 = vld [vmem:[%s657_s3 + $0x38] sm:$0xff]  }
   0x8   :  { %442 = vmatprep.subr.bf16.mxu0 %v488_v2  ;;  %472 = vmatprep.subr.bf16.mxu1 %v488_v2  ;;  %v72_v17 = vadd.f32 %v547_v9, %v49_v12  ;;  %v80_v19 = vpack.c.bf16 %v65_v15, %v64_v14  ;;  %v30_v29 = vld [vmem:[%s658_s0 + $0x60] sm:$0xff]  ;;  %v45_v35 = vmul.f32 %v540_v6, %v22_v27  ;;  %v24_v45 = vld [vmem:[%s658_s0 + $0x30] sm:$0xff]  ;;  %v25_v49 = vld [vmem:[%s658_s0 + $0x38] sm:$0xff] }
   0x9   :  { %v46_v36 = vmul.f32 %v540_v6, %v23_v28  ;;  %v53_v37 = vmul.f32 %v540_v6, %v30_v29  ;;  %v54_v38 = vmul.f32 %v540_v6, %v31_v30  ;;  %v66_v40 = vadd.f32 %v547_v9, %v43_v31  ;;  %v32_v50 = vld [vmem:[%s658_s0 + $0x70] sm:$0xff]  ;;  %v33_v51 = vld [vmem:[%s658_s0 + $0x78] sm:$0xff] }
   0xa   :  { %v84_v20 = vpack.c.bf16 %v73_v18, %v72_v17  ;;  %454 = vmatprep.mubr.bf16.mxu0 %v80_v19  ;;  %v67_v41 = vadd.f32 %v547_v9, %v44_v32  ;;  %v74_v42 = vadd.f32 %v547_v9, %v51_v33  ;;  %v75_v43 = vadd.f32 %v547_v9, %v52_v34 }
   0xb   :  { %443 = vmatpush3.bf16.msra.mxu0 %v488_v2  ;;  %480 = vmatpush3.bf16.msra.mxu1 %v488_v2  ;;  %v68_v44 = vadd.f32 %v547_v9, %v45_v35  ;;  %v69_v46 = vadd.f32 %v547_v9, %v46_v36  ;;  %v76_v47 = vadd.f32 %v547_v9, %v53_v37 }
   0xc   :  { %444 = vmatprep.subr.bf16.mxu0 %v489_v3  ;;  %473 = vmatprep.subr.bf16.mxu1 %v489_v3  ;;  %v77_v48 = vadd.f32 %v547_v9, %v54_v38  ;;  %v81_v52 = vpack.c.bf16 %v67_v41, %v66_v40  ;;  %v47_v53 = vmul.f32 %v540_v6, %v24_v45 }
   0xd   :  { %462 = vmatprep.mubr.bf16.mxu1 %v84_v20  ;;  %v85_v54 = vpack.c.bf16 %v75_v43, %v74_v42  ;;  %v48_v55 = vmul.f32 %v540_v6, %v25_v49  ;;  %v55_v56 = vmul.f32 %v540_v6, %v32_v50  ;;  %v56_v57 = vmul.f32 %v540_v6, %v33_v51 }
   0xe   :  { %v82_v58 = vpack.c.bf16 %v69_v46, %v68_v44  ;;  %v86_v59 = vpack.c.bf16 %v77_v48, %v76_v47  ;;  %v70_v60 = vadd.f32 %v547_v9, %v47_v53 }
   0xf   :  { %445 = vmatpush3.bf16.msra.mxu0 %v489_v3  ;;  %481 = vmatpush3.bf16.msra.mxu1 %v489_v3  ;;  %v71_v61 = vadd.f32 %v547_v9, %v48_v55  ;;  %v78_v62 = vadd.f32 %v547_v9, %v55_v56  ;;  %v79_v63 = vadd.f32 %v547_v9, %v56_v57 }
  0x10   :  { %446 = vmatprep.subr.bf16.mxu0 %v490_v16  ;;  %474 = vmatprep.subr.bf16.mxu1 %v490_v16 }
  0x11   :  { %v83_v0 = vpack.c.bf16 %v71_v61, %v70_v60  ;;  %v87_v1 = vpack.c.bf16 %v79_v63, %v78_v62 }
  0x13   :  { %447 = vmatpush3.bf16.msra.mxu0 %v490_v16  ;;  %482 = vmatpush3.bf16.msra.mxu1 %v490_v16 }
  0x14   :  { %448 = vmatprep.subr.bf16.mxu0 %v491_v21  ;;  %475 = vmatprep.subr.bf16.mxu1 %v491_v21 }
  0x17   :  { %449 = vmatpush3.bf16.msra.mxu0 %v491_v21  ;;  %483 = vmatpush3.bf16.msra.mxu1 %v491_v21 }
  0x18   :  { %450 = vmatprep.subr.bf16.mxu0 %v492_v22  ;;  %476 = vmatprep.subr.bf16.mxu1 %v492_v22 }
  0x1b   :  { %451 = vmatpush3.bf16.msra.mxu0 %v492_v22  ;;  %484 = vmatpush3.bf16.msra.mxu1 %v492_v22 }
  0x1c   :  { %452 = vmatprep.subr.bf16.mxu0 %v493_v39  ;;  %477 = vmatprep.subr.bf16.mxu1 %v493_v39 }
  0x1f   :  { %453 = vmatpush3.bf16.msra.mxu0 %v493_v39  ;;  %485 = vmatpush3.bf16.msra.mxu1 %v493_v39 }
  0x22   :  { %455 = vmatmul.mubr.bf16.vlgmr.msra.gmra.mrb[0].mxu0 %v81_v52  ;;  %463 = vmatmul.mubr.bf16.vlgmr.msra.gmra.mrb[0].mxu1 %v85_v54 }
  0x23   :  { %458 = vmatprep.mubr.bf16.mxu0 %v82_v58  ;;  %466 = vmatprep.mubr.bf16.mxu1 %v86_v59 }
  0x2a   :  { %459 = vmatmul.mubr.bf16.gmra.mrb[4].mxu0 %v83_v0  ;;  %467 = vmatmul.mubr.bf16.gmra.mrb[4].mxu1 %v87_v1 }
  0xf5   :  { %v456_v2 = vpop.f32.mrb[0].mxu0  ;;  %v464_v3 = vpop.f32.mrb[0].mxu1 }
  0xf6   :  { %v186_v4 = vpop.f32.mrb[1].mxu0  ;;  %v218_v5 = vpop.f32.mrb[1].mxu1 }
  0xf7   :  { %v457_v6 = vpop.f32.mrb[2].mxu0  ;;  %v465_v7 = vpop.f32.mrb[2].mxu1 }
  0xf8   :  { %v383_v8 = vpack.c.bf16 %v457_v6, %v456_v2  ;;  %v403_v10 = vpack.c.bf16 %v465_v7, %v464_v3  ;;  %v189_v11 = vpop.f32.mrb[3].mxu0  ;;  %v221_v12 = vpop.f32.mrb[3].mxu1 }
  0xf9   :  { %v378_v13 = vpack.c.bf16 %v189_v11, %v186_v4  ;;  %v398_v14 = vpack.c.bf16 %v221_v12, %v218_v5 }
  0xfa   :  { %415 = vst [vmem:[%s661_s4 + $0x8] sm:$0xff] %v383_v8   ;;  %419 = vst [vmem:[%s661_s4 + $0x28] sm:$0xff] %v403_v10  }
  0xfb   :  { %379 = vst [vmem:[%s661_s4] sm:$0xff] %v378_v13   ;;  %418 = vst [vmem:[%s661_s4 + $0x20] sm:$0xff] %v398_v14  }
  0xfd   :  { %v460_v9 = vpop.f32.mrb[4].mxu0  ;;  %v468_v15 = vpop.f32.mrb[4].mxu1 }
  0xfe   :  { %v202_v16 = vpop.f32.mrb[5].mxu0  ;;  %v234_v17 = vpop.f32.mrb[5].mxu1 }
  0xff   :  { %v461_v18 = vpop.f32.mrb[6].mxu0  ;;  %v469_v19 = vpop.f32.mrb[6].mxu1 }
 0x100   :  { %v393_v20 = vpack.c.bf16 %v461_v18, %v460_v9  ;;  %v413_v21 = vpack.c.bf16 %v469_v19, %v468_v15  ;;  %v205_v22 = vpop.f32.mrb[7].mxu0  ;;  %v237_v23 = vpop.f32.mrb[7].mxu1 }
 0x101   :  { %v388_v24 = vpack.c.bf16 %v205_v22, %v202_v16  ;;  %v408_v25 = vpack.c.bf16 %v237_v23, %v234_v17 }
 0x102   :  { %417 = vst [vmem:[%s661_s4 + $0x18] sm:$0xff] %v393_v20   ;;  %421 = vst [vmem:[%s661_s4 + $0x38] sm:$0xff] %v413_v21  }
 0x103   :  { %416 = vst [vmem:[%s661_s4 + $0x10] sm:$0xff] %v388_v24   ;;  %420 = vst [vmem:[%s661_s4 + $0x30] sm:$0xff] %v408_v25  }

// kernel: gcn_encoder_forward.9
= control target key start
LH: loop header
LB: loop body
LE: loop exit
PB: predicated region body
PF: predicated region fallthrough
CT: control target
= control target key end

     0   :  { %s673_s3 = inlined_call_operand.vmem [shape: bf16[128,128], index: 3, kind: input, shape index: {}]   ;;  %s674_s0 = inlined_call_operand.vmem [shape: f32[128,128], index: 0, kind: input, shape index: {}]   ;;  %s675_s1 = inlined_call_operand.vmem [shape: f32[1,128], index: 1, kind: input, shape index: {}]   ;;  %s676_s2 = inlined_call_operand.vmem [shape: f32[1,128], index: 2, kind: input, shape index: {}]   ;;  %s677_s4 = inlined_call_operand.vmem [shape: bf16[128,128], index: 4, kind: output, shape index: {}]  }
   0x1   :  { %v502_v0 = vld [vmem:[%s673_s3] sm:$0xff]   ;;  %v503_v1 = vld [vmem:[%s673_s3 + $0x8] sm:$0xff]   ;;  %v504_v2 = vld [vmem:[%s673_s3 + $0x10] sm:$0xff]  }
   0x2   :  { %454 = vmatprep.subr.bf16.mxu0 %v502_v0  ;;  %486 = vmatprep.subr.bf16.mxu1 %v502_v0  ;;  %v505_v3 = vld [vmem:[%s673_s3 + $0x18] sm:$0xff]   ;;  %v18_v4 = vld [vmem:[%s674_s0] sm:$0xff]  ;;  %v19_v5 = vld [vmem:[%s674_s0 + $0x8] sm:$0xff] }
   0x3   :  { %455 = vmatpush3.bf16.msra.mxu0 %v502_v0  ;;  %494 = vmatpush3.bf16.msra.mxu1 %v502_v0  ;;  %v556_v6 = vld [vmem:[%s675_s1] ss:$0 sm:$0xff]  ;;  %v27_v11 = vld [vmem:[%s674_s0 + $0x48] sm:$0xff]  ;;  %v20_v21 = vld [vmem:[%s674_s0 + $0x10] sm:$0xff] }
   0x4   :  { %456 = vmatprep.subr.bf16.mxu0 %v503_v1  ;;  %487 = vmatprep.subr.bf16.mxu1 %v503_v1  ;;  %v41_v7 = vmul.f32 %v556_v6, %v18_v4  ;;  %v42_v8 = vmul.f32 %v556_v6, %v19_v5  ;;  %v563_v9 = vld [vmem:[%s676_s2] ss:$0 sm:$0xff]  ;;  %v50_v13 = vmul.f32 %v556_v6, %v27_v11  ;;  %v21_v24 = vld [vmem:[%s674_s0 + $0x18] sm:$0xff]  ;;  %v28_v25 = vld [vmem:[%s674_s0 + $0x50] sm:$0xff] }
   0x5   :  { %v26_v10 = vld [vmem:[%s674_s0 + $0x40] sm:$0xff]  ;;  %v29_v26 = vld [vmem:[%s674_s0 + $0x58] sm:$0xff]  ;;  %v507_v27 = vld [vmem:[%s673_s3 + $0x28] sm:$0xff]   ;;  %v43_v34 = vmul.f32 %v556_v6, %v20_v21  ;;  %v44_v35 = vmul.f32 %v556_v6, %v21_v24  ;;  %v51_v36 = vmul.f32 %v556_v6, %v28_v25 }
   0x6   :  { %v49_v12 = vmul.f32 %v556_v6, %v26_v10  ;;  %v64_v14 = vadd.f32 %v563_v9, %v41_v7  ;;  %v65_v15 = vadd.f32 %v563_v9, %v42_v8  ;;  %v506_v16 = vld [vmem:[%s673_s3 + $0x20] sm:$0xff]   ;;  %v73_v18 = vadd.f32 %v563_v9, %v50_v13  ;;  %v23_v31 = vld [vmem:[%s674_s0 + $0x28] sm:$0xff]  ;;  %v508_v42 = vld [vmem:[%s673_s3 + $0x30] sm:$0xff]  }
   0x7   :  { %457 = vmatpush3.bf16.msra.mxu0 %v503_v1  ;;  %495 = vmatpush3.bf16.msra.mxu1 %v503_v1  ;;  %v22_v29 = vld [vmem:[%s674_s0 + $0x20] sm:$0xff]  ;;  %v31_v33 = vld [vmem:[%s674_s0 + $0x68] sm:$0xff]  ;;  %v52_v37 = vmul.f32 %v556_v6, %v29_v26  ;;  %v46_v39 = vmul.f32 %v556_v6, %v23_v31  ;;  %v66_v43 = vadd.f32 %v563_v9, %v43_v34  ;;  %v24_v48 = vld [vmem:[%s674_s0 + $0x30] sm:$0xff] }
   0x8   :  { %458 = vmatprep.subr.bf16.mxu0 %v504_v2  ;;  %488 = vmatprep.subr.bf16.mxu1 %v504_v2  ;;  %v72_v17 = vadd.f32 %v563_v9, %v49_v12  ;;  %v80_v19 = vmax.f32 %v64_v14, 0.0  ;;  %v81_v20 = vmax.f32 %v65_v15, 0.0  ;;  %v89_v23 = vmax.f32 %v73_v18, 0.0  ;;  %v30_v32 = vld [vmem:[%s674_s0 + $0x60] sm:$0xff]  ;;  %v25_v52 = vld [vmem:[%s674_s0 + $0x38] sm:$0xff]  ;;  %v32_v53 = vld [vmem:[%s674_s0 + $0x70] sm:$0xff] }
   0x9   :  { %v45_v38 = vmul.f32 %v556_v6, %v22_v29  ;;  %v53_v40 = vmul.f32 %v556_v6, %v30_v32  ;;  %v54_v41 = vmul.f32 %v556_v6, %v31_v33  ;;  %v67_v44 = vadd.f32 %v563_v9, %v44_v35  ;;  %v33_v54 = vld [vmem:[%s674_s0 + $0x78] sm:$0xff] }
   0xa   :  { %v88_v22 = vmax.f32 %v72_v17, 0.0  ;;  %v96_v28 = vpack.c.bf16 %v81_v20, %v80_v19  ;;  %v74_v45 = vadd.f32 %v563_v9, %v51_v36  ;;  %v75_v46 = vadd.f32 %v563_v9, %v52_v37  ;;  %v509_v55 = vld [vmem:[%s673_s3 + $0x38] sm:$0xff]  }
   0xb   :  { %459 = vmatpush3.bf16.msra.mxu0 %v504_v2  ;;  %496 = vmatpush3.bf16.msra.mxu1 %v504_v2  ;;  %v68_v47 = vadd.f32 %v563_v9, %v45_v38  ;;  %v69_v49 = vadd.f32 %v563_v9, %v46_v39  ;;  %v76_v50 = vadd.f32 %v563_v9, %v53_v40  ;;  %v82_v56 = vmax.f32 %v66_v43, 0.0 }
   0xc   :  { %460 = vmatprep.subr.bf16.mxu0 %v505_v3  ;;  %489 = vmatprep.subr.bf16.mxu1 %v505_v3  ;;  %v100_v30 = vpack.c.bf16 %v89_v23, %v88_v22  ;;  %v77_v51 = vadd.f32 %v563_v9, %v54_v41  ;;  %v83_v57 = vmax.f32 %v67_v44, 0.0  ;;  %v90_v58 = vmax.f32 %v74_v45, 0.0 }
   0xd   :  { %470 = vmatprep.mubr.bf16.mxu0 %v96_v28  ;;  %v91_v59 = vmax.f32 %v75_v46, 0.0  ;;  %v47_v60 = vmul.f32 %v556_v6, %v24_v48  ;;  %v48_v61 = vmul.f32 %v556_v6, %v25_v52  ;;  %v55_v62 = vmul.f32 %v556_v6, %v32_v53 }
   0xe   :  { %478 = vmatprep.mubr.bf16.mxu1 %v100_v30  ;;  %v56_v63 = vmul.f32 %v556_v6, %v33_v54  ;;  %v84_v0 = vmax.f32 %v68_v47, 0.0  ;;  %v85_v1 = vmax.f32 %v69_v49, 0.0  ;;  %v92_v2 = vmax.f32 %v76_v50, 0.0 }
   0xf   :  { %461 = vmatpush3.bf16.msra.mxu0 %v505_v3  ;;  %497 = vmatpush3.bf16.msra.mxu1 %v505_v3  ;;  %v93_v3 = vmax.f32 %v77_v51, 0.0  ;;  %v97_v4 = vpack.c.bf16 %v83_v57, %v82_v56  ;;  %v101_v5 = vpack.c.bf16 %v91_v59, %v90_v58  ;;  %v70_v7 = vadd.f32 %v563_v9, %v47_v60 }
  0x10   :  { %462 = vmatprep.subr.bf16.mxu0 %v506_v16  ;;  %490 = vmatprep.subr.bf16.mxu1 %v506_v16  ;;  %v71_v8 = vadd.f32 %v563_v9, %v48_v61  ;;  %v78_v10 = vadd.f32 %v563_v9, %v55_v62  ;;  %v79_v11 = vadd.f32 %v563_v9, %v56_v63 }
  0x11   :  { %v98_v6 = vpack.c.bf16 %v85_v1, %v84_v0  ;;  %v102_v12 = vpack.c.bf16 %v93_v3, %v92_v2  ;;  %v86_v13 = vmax.f32 %v70_v7, 0.0 }
  0x12   :  { %v87_v14 = vmax.f32 %v71_v8, 0.0  ;;  %v94_v15 = vmax.f32 %v78_v10, 0.0 }
  0x13   :  { %463 = vmatpush3.bf16.msra.mxu0 %v506_v16  ;;  %498 = vmatpush3.bf16.msra.mxu1 %v506_v16  ;;  %v95_v16 = vmax.f32 %v79_v11, 0.0 }
  0x14   :  { %464 = vmatprep.subr.bf16.mxu0 %v507_v27  ;;  %491 = vmatprep.subr.bf16.mxu1 %v507_v27  ;;  %v99_v17 = vpack.c.bf16 %v87_v14, %v86_v13 }
  0x15   :  { %v103_v18 = vpack.c.bf16 %v95_v16, %v94_v15 }
  0x17   :  { %465 = vmatpush3.bf16.msra.mxu0 %v507_v27  ;;  %499 = vmatpush3.bf16.msra.mxu1 %v507_v27 }
  0x18   :  { %466 = vmatprep.subr.bf16.mxu0 %v508_v42  ;;  %492 = vmatprep.subr.bf16.mxu1 %v508_v42 }
  0x1b   :  { %467 = vmatpush3.bf16.msra.mxu0 %v508_v42  ;;  %500 = vmatpush3.bf16.msra.mxu1 %v508_v42 }
  0x1c   :  { %468 = vmatprep.subr.bf16.mxu0 %v509_v55  ;;  %493 = vmatprep.subr.bf16.mxu1 %v509_v55 }
  0x1f   :  { %469 = vmatpush3.bf16.msra.mxu0 %v509_v55  ;;  %501 = vmatpush3.bf16.msra.mxu1 %v509_v55 }
  0x22   :  { %471 = vmatmul.mubr.bf16.vlgmr.msra.gmra.mrb[0].mxu0 %v97_v4  ;;  %479 = vmatmul.mubr.bf16.vlgmr.msra.gmra.mrb[0].mxu1 %v101_v5 }
  0x23   :  { %474 = vmatprep.mubr.bf16.mxu0 %v98_v6  ;;  %482 = vmatprep.mubr.bf16.mxu1 %v102_v12 }
  0x2a   :  { %475 = vmatmul.mubr.bf16.gmra.mrb[4].mxu0 %v99_v17  ;;  %483 = vmatmul.mubr.bf16.gmra.mrb[4].mxu1 %v103_v18 }
  0xf5   :  { %v472_v19 = vpop.f32.mrb[0].mxu0  ;;  %v480_v20 = vpop.f32.mrb[0].mxu1 }
  0xf6   :  { %v202_v21 = vpop.f32.mrb[1].mxu0  ;;  %v234_v9 = vpop.f32.mrb[1].mxu1 }
  0xf7   :  { %v473_v22 = vpop.f32.mrb[2].mxu0  ;;  %v481_v23 = vpop.f32.mrb[2].mxu1 }
  0xf8   :  { %v399_v24 = vpack.c.bf16 %v473_v22, %v472_v19  ;;  %v419_v25 = vpack.c.bf16 %v481_v23, %v480_v20  ;;  %v205_v26 = vpop.f32.mrb[3].mxu0  ;;  %v237_v27 = vpop.f32.mrb[3].mxu1 }
  0xf9   :  { %v394_v28 = vpack.c.bf16 %v205_v26, %v202_v21  ;;  %v414_v29 = vpack.c.bf16 %v237_v27, %v234_v9 }
  0xfa   :  { %431 = vst [vmem:[%s677_s4 + $0x8] sm:$0xff] %v399_v24   ;;  %435 = vst [vmem:[%s677_s4 + $0x28] sm:$0xff] %v419_v25  }
  0xfb   :  { %395 = vst [vmem:[%s677_s4] sm:$0xff] %v394_v28   ;;  %434 = vst [vmem:[%s677_s4 + $0x20] sm:$0xff] %v414_v29  }
  0xfd   :  { %v476_v30 = vpop.f32.mrb[4].mxu0  ;;  %v484_v31 = vpop.f32.mrb[4].mxu1 }
  0xfe   :  { %v218_v32 = vpop.f32.mrb[5].mxu0  ;;  %v250_v33 = vpop.f32.mrb[5].mxu1 }
  0xff   :  { %v477_v34 = vpop.f32.mrb[6].mxu0  ;;  %v485_v35 = vpop.f32.mrb[6].mxu1 }
 0x100   :  { %v409_v36 = vpack.c.bf16 %v477_v34, %v476_v30  ;;  %v429_v37 = vpack.c.bf16 %v485_v35, %v484_v31  ;;  %v221_v38 = vpop.f32.mrb[7].mxu0  ;;  %v253_v39 = vpop.f32.mrb[7].mxu1 }
 0x101   :  { %v404_v40 = vpack.c.bf16 %v221_v38, %v218_v32  ;;  %v424_v41 = vpack.c.bf16 %v253_v39, %v250_v33 }
 0x102   :  { %433 = vst [vmem:[%s677_s4 + $0x18] sm:$0xff] %v409_v36   ;;  %437 = vst [vmem:[%s677_s4 + $0x38] sm:$0xff] %v429_v37  }
 0x103   :  { %432 = vst [vmem:[%s677_s4 + $0x10] sm:$0xff] %v404_v40   ;;  %436 = vst [vmem:[%s677_s4 + $0x30] sm:$0xff] %v424_v41  }

// kernel: gcn_encoder_forward.8
= control target key start
LH: loop header
LB: loop body
LE: loop exit
PB: predicated region body
PF: predicated region fallthrough
CT: control target
= control target key end

     0   :  { %s623_s1 = inlined_call_operand.vmem [shape: bf16[128,128], index: 1, kind: input, shape index: {}]   ;;  %s624_s0 = inlined_call_operand.vmem [shape: bf16[128,128], index: 0, kind: input, shape index: {}]   ;;  %s625_s2 = inlined_call_operand.vmem [shape: f32[128,128], index: 2, kind: output, shape index: {0}]   ;;  %s626_s3 = inlined_call_operand.vmem [shape: f32[8,128], index: 3, kind: output, shape index: {1}]   ;;  %s627_s4 = inlined_call_operand.vmem [shape: f32[8,128], index: 4, kind: output, shape index: {2}]  }
   0x1   :  { %v480_v0 = vld [vmem:[%s623_s1] sm:$0xff]   ;;  %v481_v1 = vld [vmem:[%s623_s1 + $0x8] sm:$0xff]   ;;  %v482_v2 = vld [vmem:[%s623_s1 + $0x10] sm:$0xff]  }
   0x2   :  { %431 = vmatprep.subr.bf16.mxu0 %v480_v0  ;;  %463 = vmatprep.subr.bf16.mxu1 %v480_v0  ;;  %v483_v3 = vld [vmem:[%s623_s1 + $0x18] sm:$0xff]   ;;  %v488_v4 = vld [vmem:[%s624_s0] sm:$0xff]   ;;  %v485_v7 = vld [vmem:[%s623_s1 + $0x28] sm:$0xff]  }
   0x3   :  { %432 = vmatpush3.bf16.msra.mxu0 %v480_v0  ;;  %471 = vmatpush3.bf16.msra.mxu1 %v480_v0  ;;  %v484_v5 = vld [vmem:[%s623_s1 + $0x20] sm:$0xff]   ;;  %v486_v8 = vld [vmem:[%s623_s1 + $0x30] sm:$0xff]   ;;  %v487_v9 = vld [vmem:[%s623_s1 + $0x38] sm:$0xff]  }
   0x4   :  { %433 = vmatprep.subr.bf16.mxu0 %v481_v1  ;;  %464 = vmatprep.subr.bf16.mxu1 %v481_v1  ;;  %v492_v6 = vld [vmem:[%s624_s0 + $0x20] sm:$0xff]   ;;  %v489_v10 = vld [vmem:[%s624_s0 + $0x8] sm:$0xff]   ;;  %v490_v12 = vld [vmem:[%s624_s0 + $0x10] sm:$0xff]  }
   0x5   :  { %447 = vmatprep.mubr.bf16.mxu0 %v488_v4  ;;  %455 = vmatprep.mubr.bf16.mxu1 %v492_v6  ;;  %v493_v11 = vld [vmem:[%s624_s0 + $0x28] sm:$0xff]   ;;  %v494_v13 = vld [vmem:[%s624_s0 + $0x30] sm:$0xff]   ;;  %v491_v14 = vld [vmem:[%s624_s0 + $0x18] sm:$0xff]  }
   0x6   :  { %v495_v15 = vld [vmem:[%s624_s0 + $0x38] sm:$0xff]  }
   0x7   :  { %434 = vmatpush3.bf16.msra.mxu0 %v481_v1  ;;  %472 = vmatpush3.bf16.msra.mxu1 %v481_v1 }
   0x8   :  { %435 = vmatprep.subr.bf16.mxu0 %v482_v2  ;;  %465 = vmatprep.subr.bf16.mxu1 %v482_v2 }
   0xb   :  { %436 = vmatpush3.bf16.msra.mxu0 %v482_v2  ;;  %473 = vmatpush3.bf16.msra.mxu1 %v482_v2 }
   0xc   :  { %437 = vmatprep.subr.bf16.mxu0 %v483_v3  ;;  %466 = vmatprep.subr.bf16.mxu1 %v483_v3 }
   0xf   :  { %438 = vmatpush3.bf16.msra.mxu0 %v483_v3  ;;  %474 = vmatpush3.bf16.msra.mxu1 %v483_v3 }
  0x10   :  { %439 = vmatprep.subr.bf16.mxu0 %v484_v5  ;;  %467 = vmatprep.subr.bf16.mxu1 %v484_v5 }
  0x13   :  { %440 = vmatpush3.bf16.msra.mxu0 %v484_v5  ;;  %475 = vmatpush3.bf16.msra.mxu1 %v484_v5 }
  0x14   :  { %441 = vmatprep.subr.bf16.mxu0 %v485_v7  ;;  %468 = vmatprep.subr.bf16.mxu1 %v485_v7 }
  0x17   :  { %442 = vmatpush3.bf16.msra.mxu0 %v485_v7  ;;  %476 = vmatpush3.bf16.msra.mxu1 %v485_v7 }
  0x18   :  { %443 = vmatprep.subr.bf16.mxu0 %v486_v8  ;;  %469 = vmatprep.subr.bf16.mxu1 %v486_v8 }
  0x1b   :  { %444 = vmatpush3.bf16.msra.mxu0 %v486_v8  ;;  %477 = vmatpush3.bf16.msra.mxu1 %v486_v8 }
  0x1c   :  { %445 = vmatprep.subr.bf16.mxu0 %v487_v9  ;;  %470 = vmatprep.subr.bf16.mxu1 %v487_v9 }
  0x1f   :  { %446 = vmatpush3.bf16.msra.mxu0 %v487_v9  ;;  %478 = vmatpush3.bf16.msra.mxu1 %v487_v9 }
  0x22   :  { %448 = vmatmul.mubr.bf16.vlgmr.msra.gmra.mrb[0].mxu0 %v489_v10  ;;  %456 = vmatmul.mubr.bf16.vlgmr.msra.gmra.mrb[0].mxu1 %v493_v11 }
  0x23   :  { %451 = vmatprep.mubr.bf16.mxu0 %v490_v12  ;;  %459 = vmatprep.mubr.bf16.mxu1 %v494_v13 }
  0x2a   :  { %452 = vmatmul.mubr.bf16.gmra.mrb[4].mxu0 %v491_v14  ;;  %460 = vmatmul.mubr.bf16.gmra.mrb[4].mxu1 %v495_v15 }
  0xf5   :  { %v449_v16 = vpop.f32.mrb[0].mxu0  ;;  %v457_v17 = vpop.f32.mrb[0].mxu1 }
  0xf6   :  { %v213_v18 = vpop.f32.mrb[1].mxu0  ;;  %v245_v19 = vpop.f32.mrb[1].mxu1  ;;  %294 = vst [vmem:[%s625_s2 + $0x10] sm:$0xff] %v449_v16  ;;  %302 = vst [vmem:[%s625_s2 + $0x50] sm:$0xff] %v457_v17  ;;  %v350_v27 = vmul.f32 %v449_v16, %v449_v16  ;;  %v358_v59 = vmul.f32 %v457_v17, %v457_v17 }
  0xf7   :  { %v450_v20 = vpop.f32.mrb[2].mxu0  ;;  %v458_v21 = vpop.f32.mrb[2].mxu1  ;;  %292 = vst [vmem:[%s625_s2] sm:$0xff] %v213_v18  ;;  %300 = vst [vmem:[%s625_s2 + $0x40] sm:$0xff] %v245_v19  ;;  %v348_v24 = vmul.f32 %v213_v18, %v213_v18  ;;  %v356_v53 = vmul.f32 %v245_v19, %v245_v19 }
  0xf8   :  { %v216_v22 = vpop.f32.mrb[3].mxu0  ;;  %v248_v23 = vpop.f32.mrb[3].mxu1  ;;  %295 = vst [vmem:[%s625_s2 + $0x18] sm:$0xff] %v450_v20  ;;  %303 = vst [vmem:[%s625_s2 + $0x58] sm:$0xff] %v458_v21  ;;  %v351_v32 = vmul.f32 %v450_v20, %v450_v20  ;;  %v359_v62 = vmul.f32 %v458_v21, %v458_v21 }
  0xf9   :  { %293 = vst [vmem:[%s625_s2 + $0x8] sm:$0xff] %v216_v22  ;;  %v327_v25 = vadd.f32 %v216_v22, %v213_v18  ;;  %v349_v26 = vmul.f32 %v216_v22, %v216_v22  ;;  %301 = vst [vmem:[%s625_s2 + $0x48] sm:$0xff] %v248_v23  ;;  %v357_v58 = vmul.f32 %v248_v23, %v248_v23 }
  0xfb   :  { %v328_v28 = vadd.f32 %v449_v16, %v327_v25  ;;  %v364_v29 = vadd.f32 %v349_v26, %v348_v24 }
  0xfd   :  { %v453_v30 = vpop.f32.mrb[4].mxu0  ;;  %v461_v31 = vpop.f32.mrb[4].mxu1  ;;  %v365_v35 = vadd.f32 %v364_v29, %v350_v27  ;;  %v329_v36 = vadd.f32 %v450_v20, %v328_v28 }
  0xfe   :  { %v229_v33 = vpop.f32.mrb[5].mxu0  ;;  %v261_v34 = vpop.f32.mrb[5].mxu1  ;;  %298 = vst [vmem:[%s625_s2 + $0x30] sm:$0xff] %v453_v30  ;;  %306 = vst [vmem:[%s625_s2 + $0x70] sm:$0xff] %v461_v31  ;;  %v354_v47 = vmul.f32 %v453_v30, %v453_v30  ;;  %v362_v7 = vmul.f32 %v461_v31, %v461_v31 }
  0xff   :  { %v454_v37 = vpop.f32.mrb[6].mxu0  ;;  %v462_v38 = vpop.f32.mrb[6].mxu1  ;;  %296 = vst [vmem:[%s625_s2 + $0x20] sm:$0xff] %v229_v33  ;;  %v330_v41 = vadd.f32 %v329_v36, %v229_v33  ;;  %v352_v42 = vmul.f32 %v229_v33, %v229_v33  ;;  %v366_v43 = vadd.f32 %v365_v35, %v351_v32  ;;  %304 = vst [vmem:[%s625_s2 + $0x60] sm:$0xff] %v261_v34 }
 0x100   :  { %v232_v39 = vpop.f32.mrb[7].mxu0  ;;  %v264_v40 = vpop.f32.mrb[7].mxu1  ;;  %299 = vst [vmem:[%s625_s2 + $0x38] sm:$0xff] %v454_v37  ;;  %307 = vst [vmem:[%s625_s2 + $0x78] sm:$0xff] %v462_v38  ;;  %v355_v50 = vmul.f32 %v454_v37, %v454_v37  ;;  %v360_v1 = vmul.f32 %v261_v34, %v261_v34  ;;  %v363_v10 = vmul.f32 %v462_v38, %v462_v38 }
 0x101   :  { %v367_v44 = vadd.f32 %v366_v43, %v352_v42  ;;  %297 = vst [vmem:[%s625_s2 + $0x28] sm:$0xff] %v232_v39  ;;  %v331_v45 = vadd.f32 %v330_v41, %v232_v39  ;;  %v353_v46 = vmul.f32 %v232_v39, %v232_v39  ;;  %305 = vst [vmem:[%s625_s2 + $0x68] sm:$0xff] %v264_v40 }
 0x102   :  { %v361_v6 = vmul.f32 %v264_v40, %v264_v40 }
 0x103   :  { %v332_v48 = vadd.f32 %v453_v30, %v331_v45  ;;  %v368_v49 = vadd.f32 %v367_v44, %v353_v46 }
 0x105   :  { %v369_v51 = vadd.f32 %v368_v49, %v354_v47  ;;  %v333_v52 = vadd.f32 %v454_v37, %v332_v48 }
 0x107   :  { %v334_v54 = vadd.f32 %v333_v52, %v245_v19  ;;  %v370_v55 = vadd.f32 %v369_v51, %v355_v50 }
 0x109   :  { %v371_v56 = vadd.f32 %v370_v55, %v356_v53  ;;  %v335_v57 = vadd.f32 %v334_v54, %v248_v23 }
 0x10b   :  { %v336_v60 = vadd.f32 %v457_v17, %v335_v57  ;;  %v372_v61 = vadd.f32 %v371_v56, %v357_v58 }
 0x10d   :  { %v373_v63 = vadd.f32 %v372_v61, %v358_v59  ;;  %v337_v0 = vadd.f32 %v458_v21, %v336_v60 }
 0x10f   :  { %v338_v2 = vadd.f32 %v337_v0, %v261_v34  ;;  %v374_v3 = vadd.f32 %v373_v63, %v359_v62 }
 0x111   :  { %v375_v4 = vadd.f32 %v374_v3, %v360_v1  ;;  %v339_v5 = vadd.f32 %v338_v2, %v264_v40 }
 0x113   :  { %v340_v8 = vadd.f32 %v461_v31, %v339_v5  ;;  %v376_v9 = vadd.f32 %v375_v4, %v361_v6 }
 0x115   :  { %v341_v11 = vadd.f32 %v462_v38, %v340_v8  ;;  %v377_v12 = vadd.f32 %v376_v9, %v362_v7 }
 0x117   :  { %v342_v13 = vrot.slane %v341_v11, 4  ;;  %v378_v14 = vadd.f32 %v377_v12, %v363_v10 }
 0x119   :  { %v343_v15 = vadd.f32 %v342_v13, %v341_v11  ;;  %v379_v16 = vrot.slane %v378_v14, 4 }
 0x11b   :  { %v344_v17 = vrot.slane %v343_v15, 2  ;;  %v380_v18 = vadd.f32 %v379_v16, %v378_v14 }
 0x11d   :  { %v345_v19 = vadd.f32 %v344_v17, %v343_v15  ;;  %v381_v20 = vrot.slane %v380_v18, 2 }
 0x11f   :  { %v346_v21 = vrot.slane %v345_v19, 1  ;;  %v382_v22 = vadd.f32 %v381_v20, %v380_v18 }
 0x121   :  { %v347_v23 = vadd.f32 %v346_v21, %v345_v19  ;;  %v383_v24 = vrot.slane %v382_v22, 1 }
 0x123   :  { %v384_v25 = vadd.f32 %v383_v24, %v382_v22  ;;  %385 = vst [vmem:[%s626_s3] sm:$0xff] %v347_v23 }
 0x125   :  { %386 = vst [vmem:[%s627_s4] sm:$0xff] %v384_v25 }

// kernel: gcn_encoder_forward.13
= control target key start
LH: loop header
LB: loop body
LE: loop exit
PB: predicated region body
PF: predicated region fallthrough
CT: control target
= control target key end

     0   :  { %v265_v0 = vmov 0.0|0.0   ;;  %vm266_vm0 = vmmov 0   ;;  %v267_v4 = vmov 0.0   ;;  %s432_s0 = inlined_call_operand.vmem [shape: f32[128,128], index: 0, kind: input, shape index: {}]   ;;  %s433_s1 = inlined_call_operand.vmem [shape: f32[1,128], index: 1, kind: input, shape index: {}]   ;;  %s434_s2 = inlined_call_operand.vmem [shape: f32[1,128], index: 2, kind: input, shape index: {}]   ;;  %s435_s4 = inlined_call_operand.vmem [shape: f32[128,128], index: 4, kind: output, shape index: {0}]   ;;  %s436_s3 = inlined_call_operand.vmem [shape: f32[8,128], index: 3, kind: input, shape index: {}]   ;;  %s437_s5 = inlined_call_operand.vmem [shape: f32[8,128], index: 5, kind: output, shape index: {1}]  }
   0x1   :  { %238 = vmatprep.subr.bf16.mxu0 %v265_v0  ;;  %v19_v1 = vld [vmem:[%s432_s0] sm:$0xff]  ;;  %v20_v2 = vld [vmem:[%s432_s0 + $0x8] sm:$0xff]  ;;  %235 = vmatprep.mubr.msk.f32.mxu0 %vm266_vm0, %v267_v4  ;;  %v21_v8 = vld [vmem:[%s432_s0 + $0x10] sm:$0xff] }
   0x2   :  { %v184_v3 = vld [vmem:[%s433_s1] ss:$0 sm:$0xff]  ;;  %v22_v9 = vld [vmem:[%s432_s0 + $0x18] sm:$0xff]  ;;  %v24_v13 = vld [vmem:[%s432_s0 + $0x28] sm:$0xff] }
   0x3   :  { %v42_v5 = vmul.f32 %v184_v3, %v19_v1  ;;  %v43_v6 = vmul.f32 %v184_v3, %v20_v2  ;;  %v311_v7 = vld [vmem:[%s434_s2] ss:$0 sm:$0xff]  ;;  %v44_v10 = vmul.f32 %v184_v3, %v21_v8  ;;  %v45_v11 = vmul.f32 %v184_v3, %v22_v9  ;;  %v25_v14 = vld [vmem:[%s432_s0 + $0x30] sm:$0xff]  ;;  %v26_v19 = vld [vmem:[%s432_s0 + $0x38] sm:$0xff] }
   0x4   :  { %v23_v12 = vld [vmem:[%s432_s0 + $0x20] sm:$0xff]  ;;  %v47_v18 = vmul.f32 %v184_v3, %v24_v13  ;;  %v28_v21 = vld [vmem:[%s432_s0 + $0x48] sm:$0xff]  ;;  %v48_v24 = vmul.f32 %v184_v3, %v25_v14  ;;  %v49_v25 = vmul.f32 %v184_v3, %v26_v19  ;;  %v29_v26 = vld [vmem:[%s432_s0 + $0x50] sm:$0xff] }
   0x5   :  { %v65_v15 = vadd.f32 %v311_v7, %v42_v5  ;;  %v66_v16 = vadd.f32 %v311_v7, %v43_v6  ;;  %v46_v17 = vmul.f32 %v184_v3, %v23_v12  ;;  %v27_v20 = vld [vmem:[%s432_s0 + $0x40] sm:$0xff]  ;;  %v67_v22 = vadd.f32 %v311_v7, %v44_v10  ;;  %v30_v27 = vld [vmem:[%s432_s0 + $0x58] sm:$0xff]  ;;  %v32_v33 = vld [vmem:[%s432_s0 + $0x68] sm:$0xff] }
   0x6   :  { %v68_v23 = vadd.f32 %v311_v7, %v45_v11  ;;  %v70_v30 = vadd.f32 %v311_v7, %v47_v18  ;;  %v50_v31 = vmul.f32 %v184_v3, %v27_v20  ;;  %v31_v32 = vld [vmem:[%s432_s0 + $0x60] sm:$0xff]  ;;  %v71_v34 = vadd.f32 %v311_v7, %v48_v24  ;;  %v33_v37 = vld [vmem:[%s432_s0 + $0x70] sm:$0xff]  ;;  %v34_v38 = vld [vmem:[%s432_s0 + $0x78] sm:$0xff] }
   0x7   :  { %81 = vst [vmem:[%s435_s4] sm:$0xff] %v65_v15  ;;  %82 = vst [vmem:[%s435_s4 + $0x8] sm:$0xff] %v66_v16  ;;  %v239_v28 = vpack.c.bf16 %v66_v16, %v65_v15  ;;  %v69_v29 = vadd.f32 %v311_v7, %v46_v17  ;;  %v72_v35 = vadd.f32 %v311_v7, %v49_v25  ;;  %v103_v60 = vld [vmem:[%s436_s3] sm:$0xff] }
   0x8   :  { %83 = vst [vmem:[%s435_s4 + $0x10] sm:$0xff] %v67_v22  ;;  %84 = vst [vmem:[%s435_s4 + $0x18] sm:$0xff] %v68_v23  ;;  %v51_v36 = vmul.f32 %v184_v3, %v28_v21  ;;  %v242_v39 = vpack.c.bf16 %v68_v23, %v67_v22  ;;  %v73_v40 = vadd.f32 %v311_v7, %v50_v31 }
   0x9   :  { %240 = vmatpush3.bf16.msra.mxu0 %v239_v28  ;;  %85 = vst [vmem:[%s435_s4 + $0x20] sm:$0xff] %v69_v29  ;;  %86 = vst [vmem:[%s435_s4 + $0x28] sm:$0xff] %v70_v30  ;;  %v52_v41 = vmul.f32 %v184_v3, %v29_v26  ;;  %v53_v42 = vmul.f32 %v184_v3, %v30_v27  ;;  %v54_v44 = vmul.f32 %v184_v3, %v31_v32 }
   0xa   :  { %241 = vmatprep.subr.bf16.mxu0 %v265_v0  ;;  %87 = vst [vmem:[%s435_s4 + $0x30] sm:$0xff] %v71_v34  ;;  %88 = vst [vmem:[%s435_s4 + $0x38] sm:$0xff] %v72_v35  ;;  %v74_v43 = vadd.f32 %v311_v7, %v51_v36  ;;  %v55_v45 = vmul.f32 %v184_v3, %v32_v33  ;;  %v56_v48 = vmul.f32 %v184_v3, %v33_v37 }
   0xb   :  { %89 = vst [vmem:[%s435_s4 + $0x40] sm:$0xff] %v73_v40  ;;  %v75_v46 = vadd.f32 %v311_v7, %v52_v41  ;;  %v76_v47 = vadd.f32 %v311_v7, %v53_v42  ;;  %v57_v49 = vmul.f32 %v184_v3, %v34_v38  ;;  %v77_v50 = vadd.f32 %v311_v7, %v54_v44 }
   0xc   :  { %90 = vst [vmem:[%s435_s4 + $0x48] sm:$0xff] %v74_v43  ;;  %v78_v51 = vadd.f32 %v311_v7, %v55_v45  ;;  %v245_v52 = vpack.c.bf16 %v70_v30, %v69_v29  ;;  %v79_v53 = vadd.f32 %v311_v7, %v56_v48  ;;  %v248_v55 = vpack.c.bf16 %v72_v35, %v71_v34 }
   0xd   :  { %243 = vmatpush3.bf16.msra.mxu0 %v242_v39  ;;  %91 = vst [vmem:[%s435_s4 + $0x50] sm:$0xff] %v75_v46  ;;  %92 = vst [vmem:[%s435_s4 + $0x58] sm:$0xff] %v76_v47  ;;  %v80_v54 = vadd.f32 %v311_v7, %v57_v49  ;;  %v251_v56 = vpack.c.bf16 %v74_v43, %v73_v40  ;;  %v254_v57 = vpack.c.bf16 %v76_v47, %v75_v46 }
   0xe   :  { %244 = vmatprep.subr.bf16.mxu0 %v265_v0  ;;  %93 = vst [vmem:[%s435_s4 + $0x60] sm:$0xff] %v77_v50  ;;  %94 = vst [vmem:[%s435_s4 + $0x68] sm:$0xff] %v78_v51  ;;  %v257_v58 = vpack.c.bf16 %v78_v51, %v77_v50 }
   0xf   :  { %95 = vst [vmem:[%s435_s4 + $0x70] sm:$0xff] %v79_v53  ;;  %96 = vst [vmem:[%s435_s4 + $0x78] sm:$0xff] %v80_v54  ;;  %v260_v59 = vpack.c.bf16 %v80_v54, %v79_v53 }
  0x11   :  { %246 = vmatpush3.bf16.msra.mxu0 %v245_v52 }
  0x12   :  { %247 = vmatprep.subr.bf16.mxu0 %v265_v0 }
  0x15   :  { %249 = vmatpush3.bf16.msra.mxu0 %v248_v55 }
  0x16   :  { %250 = vmatprep.subr.bf16.mxu0 %v265_v0 }
  0x19   :  { %252 = vmatpush3.bf16.msra.mxu0 %v251_v56 }
  0x1a   :  { %253 = vmatprep.subr.bf16.mxu0 %v265_v0 }
  0x1d   :  { %255 = vmatpush3.bf16.msra.mxu0 %v254_v57 }
  0x1e   :  { %256 = vmatprep.subr.bf16.mxu0 %v265_v0 }
  0x21   :  { %258 = vmatpush3.bf16.msra.mxu0 %v257_v58 }
  0x22   :  { %259 = vmatprep.subr.bf16.mxu0 %v265_v0 }
  0x25   :  { %261 = vmatpush3.bf16.msra.mxu0 %v260_v59 }
  0x28   :  { %236 = vmatmul.mubr.f32.vlgmr.msra.gmra.mrb[0].mxu0 %v103_v60 }
  0xfb   :  { %v170_v61 = vpop.f32.mrb[0].mxu0 }
  0xfc   :  { %v237_v62 = vpop.f32.mrb[1].mxu0  ;;  %175 = vst [vmem:[%s437_s5] sm:$0xff] %v170_v61 }

</bundles_post_ra>
